<compile_context>
chip_gen: v7x
topology: tpu7x:2x2x1
jax: 0.10.0
libtpu: 0.0.40
codegen_flags: <defaults>
</compile_context>

<pallas_src>
import math

import jax
import jax.numpy as jnp
from jax.experimental import pallas as pl
from jax.experimental.pallas import tpu as pltpu


def _round_up(x: int, m: int) -> int:
    return ((x + m - 1) // m) * m


# ----------------------------------------------------------------------------
# kernel
# ----------------------------------------------------------------------------
def _cmmmf_kernel(v1_ref, v2_ref, w1_ref, b1_ref, w2_ref, b2_ref,
                  wa1_ref, ap_ref, ba2_ref, out_ref):
    """Fused CMMMF forward for one batch tile.

    v1_ref : (tb, dim1)      modality-1 input rows
    v2_ref : (tb, dim2)      modality-2 input rows
    w1_ref : (dim1, odim)    dense1 weight (transposed)
    b1_ref : (1, odim)       dense1 bias
    w2_ref : (dim2, odim)    dense2 weight (transposed)
    b2_ref : (1, odim)       dense2 bias
    wa1_ref: (odim, half)    Conv2d(odim, odim//2, 1) weight (transposed)
    ap_ref : (2, half)       row 0 = ba1, row 1 = wa2 (Conv2d(odim//2, 1, 1) weight)
    ba2_ref: (1,) in SMEM    scalar bias of the 1-channel conv
    out_ref: (tb, odim)      v1d * a1 + v2d * a2
    """
    f32 = jnp.float32

    # dense1 / dense2 (+ ReLU; Dropout(p=0.5) is identity at eval time).
    v1d = jnp.maximum(
        jnp.dot(v1_ref[...].astype(f32), w1_ref[...],
                preferred_element_type=f32) + b1_ref[...], 0.0)        # (tb, odim)
    v2d = jnp.maximum(
        jnp.dot(v2_ref[...].astype(f32), w2_ref[...],
                preferred_element_type=f32) + b2_ref[...], 0.0)        # (tb, odim)

    # multimodal_attention: 1x1 convs applied independently per modality
    # "position" (the (2,1) spatial grid of the PyTorch Conv2d stack).
    ba1 = ap_ref[0:1, :]                                               # (1, half)
    wa2 = ap_ref[1:2, :]                                               # (1, half)
    a1h = jnp.maximum(
        jnp.dot(v1d, wa1_ref[...], preferred_element_type=f32) + ba1, 0.0)
    a2h = jnp.maximum(
        jnp.dot(v2d, wa1_ref[...], preferred_element_type=f32) + ba1, 0.0)

    # second 1x1 conv (half -> 1 channel): VPU multiply + lane reduction.
    ba2 = ba2_ref[0]
    a1 = jnp.sum(a1h * wa2, axis=-1, keepdims=True) + ba2              # (tb, 1)
    a2 = jnp.sum(a2h * wa2, axis=-1, keepdims=True) + ba2              # (tb, 1)

    # h = matmul(feats, ma)  ==  v1d * a1 + v2d * a2  (attention-weighted sum)
    out_ref[...] = (v1d * a1 + v2d * a2).astype(out_ref.dtype)


# ----------------------------------------------------------------------------
# module wrapper
# ----------------------------------------------------------------------------
class CMMMFPallas:
    """JAX/Pallas port of the PyTorch CMMMF module (inference mode)."""

    def __init__(self, dim1, dim2, odim, key=None):
        assert odim % 2 == 0, "odim must be even (odim // 2 attention channels)"
        self.dim1, self.dim2, self.odim = dim1, dim2, odim
        self.half = odim // 2
        if key is None:
            key = jax.random.PRNGKey(0)

        def uni(k, shape, fan_in):
            bound = 1.0 / math.sqrt(float(fan_in))
            return jax.random.uniform(k, shape, jnp.float32, -bound, bound)

        ks = jax.random.split(key, 8)
        half = self.half
        w1 = uni(ks[0], (dim1, odim), dim1)      # dense1 weight (transposed)
        b1 = uni(ks[1], (odim,), dim1)
        w2 = uni(ks[2], (dim2, odim), dim2)      # dense2 weight (transposed)
        b2 = uni(ks[3], (odim,), dim2)
        wa1 = uni(ks[4], (odim, half), odim)     # Conv2d(odim, odim//2, 1)
        ba1 = uni(ks[5], (half,), odim)
        wa2 = uni(ks[6], (half,), half)          # Conv2d(odim//2, 1, 1)
        ba2 = uni(ks[7], (), half)
        self.params = dict(w1=w1, b1=b1, w2=w2, b2=b2,
                           wa1=wa1, ba1=ba1, wa2=wa2, ba2=ba2)

        # ---- host-side packing (done once, no block-diag / no zero padding) --
        self.w1 = w1                                    # (dim1, odim)
        self.w2 = w2                                    # (dim2, odim)
        self.b1r = b1[None, :]                          # (1, odim)
        self.b2r = b2[None, :]                          # (1, odim)
        self.wa1 = wa1                                  # (odim, half)
        self.att_pack = jnp.stack([ba1, wa2])           # (2, half): [ba1; wa2]
        self.ba2 = ba2.reshape(1)                       # (1,) SMEM scalar

    # ------------------------------------------------------------------ call
    def __call__(self, vec1, vec2):
        if vec1.ndim == 1:
            vec1 = vec1[None, :]
        if vec2.ndim == 1:
            vec2 = vec2[None, :]
        assert vec1.shape[-1] == self.dim1 and vec2.shape[-1] == self.dim2
        assert vec1.shape[0] == vec2.shape[0]

        B = vec1.shape[0]
        dim1, dim2, odim, half = self.dim1, self.dim2, self.odim, self.half
        out_dtype = jnp.promote_types(vec1.dtype, vec2.dtype)

        # Fat batch tiles: >= 2 grid steps whenever B > tb (v7x megacore),
        # capped at 2048 rows, rounded to the sublane multiple of 8.  The
        # ragged last block is clipped by Pallas (rows are independent, so
        # garbage in the padded tail never reaches valid output rows).
        tb = min(2048, _round_up(pl.cdiv(B, 2), 8))
        tb = max(8, tb)
        grid = (pl.cdiv(B, tb),)

        # advisory cost estimate for XLA's scheduler.
        itemsize = jnp.dtype(out_dtype).itemsize
        flops = 2 * B * (dim1 * odim + dim2 * odim + 2 * odim * half) + 8 * B * odim
        bytes_accessed = (
            B * dim1 * jnp.dtype(vec1.dtype).itemsize
            + B * dim2 * jnp.dtype(vec2.dtype).itemsize
            + B * odim * itemsize
            + 4 * (dim1 * odim + dim2 * odim + odim * half + 2 * odim + 2 * half + 1))

        return pl.pallas_call(
            _cmmmf_kernel,
            out_shape=jax.ShapeDtypeStruct((B, odim), out_dtype),
            grid=grid,
            in_specs=[
                pl.BlockSpec((tb, dim1), lambda i: (i, 0)),
                pl.BlockSpec((tb, dim2), lambda i: (i, 0)),
                pl.BlockSpec((dim1, odim), lambda i: (0, 0)),
                pl.BlockSpec((1, odim), lambda i: (0, 0)),
                pl.BlockSpec((dim2, odim), lambda i: (0, 0)),
                pl.BlockSpec((1, odim), lambda i: (0, 0)),
                pl.BlockSpec((odim, half), lambda i: (0, 0)),
                pl.BlockSpec((2, half), lambda i: (0, 0)),
                pl.BlockSpec(memory_space=pltpu.MemorySpace.SMEM),
            ],
            out_specs=pl.BlockSpec((tb, odim), lambda i: (i, 0)),
            compiler_params=pltpu.CompilerParams(
                dimension_semantics=("parallel",)),
            cost_estimate=pl.CostEstimate(
                flops=flops, transcendentals=0, bytes_accessed=bytes_accessed),
        )(vec1, vec2, self.w1, self.b1r, self.w2, self.b2r,
          self.wa1, self.att_pack, self.ba2)

    # ------------------------------------------------------------- reference
    def reference(self, vec1, vec2):
        """Pure-JAX eval-mode reference mirroring the PyTorch forward."""
        if vec1.ndim == 1:
            vec1 = vec1[None, :]
        if vec2.ndim == 1:
            vec2 = vec2[None, :]
        p = self.params
        relu = lambda t: jnp.maximum(t, 0.0)
        v1d = relu(vec1 @ p["w1"] + p["b1"])          # dense1 (+ identity dropout)
        v2d = relu(vec2 @ p["w2"] + p["b2"])          # dense2 (+ identity dropout)
        # multimodal_attention per "position" (1x1 convs over the (2,1) grid);
        # NOTE: the original PyTorch module applies NO softmax over modalities.
        a1 = relu(v1d @ p["wa1"] + p["ba1"]) @ p["wa2"][:, None] + p["ba2"]
        a2 = relu(v2d @ p["wa1"] + p["ba1"]) @ p["wa2"][:, None] + p["ba2"]
        # h = matmul(feats, ma)  ==  v1d * a1 + v2d * a2
        return v1d * a1 + v2d * a2


# ----------------------------------------------------------------------------
# demo
# ----------------------------------------------------------------------------
if __name__ == "__main__":
    # full-f32 matmuls everywhere so the kernel/reference comparison is tight.
    jax.config.update("jax_default_matmul_precision", "highest")

    B, DIM1, DIM2, ODIM = 8, 32, 48, 64
    key = jax.random.PRNGKey(0)
    k1, k2, kp = jax.random.split(key, 3)
    vec1 = jax.random.normal(k1, (B, DIM1), jnp.float32)
    vec2 = jax.random.normal(k2, (B, DIM2), jnp.float32)

    model = CMMMFPallas(DIM1, DIM2, ODIM, key=kp)
    out = model(vec1, vec2)
    out = jax.block_until_ready(out)

    ref = model.reference(vec1, vec2)
    assert out.shape == (B, ODIM), out.shape
    assert jnp.allclose(out, ref, atol=1e-5, rtol=1e-5), (
        "CMMMF mismatch, max abs err = %e" % float(jnp.max(jnp.abs(out - ref))))

    print("KERNEL_OK")
</pallas_src>

<mosaic_0001>
module attributes {stable_mosaic.version = 11 : i64} {
  func.func @_cmmmf_kernel(%arg0: i32, %arg1: memref<8x32xf32, #tpu.memory_space<vmem>>, %arg2: memref<8x48xf32, #tpu.memory_space<vmem>>, %arg3: memref<32x64xf32, #tpu.memory_space<vmem>>, %arg4: memref<1x64xf32, #tpu.memory_space<vmem>>, %arg5: memref<48x64xf32, #tpu.memory_space<vmem>>, %arg6: memref<1x64xf32, #tpu.memory_space<vmem>>, %arg7: memref<64x32xf32, #tpu.memory_space<vmem>>, %arg8: memref<2x32xf32, #tpu.memory_space<vmem>>, %arg9: memref<1xf32, #tpu.memory_space<smem>>, %arg10: memref<8x64xf32, #tpu.memory_space<vmem>>) attributes {dimension_semantics = [#tpu.dimension_semantics<parallel>], iteration_bounds = array<i64: 1>, scalar_prefetch = 0 : i64, scratch_operands = 0 : i64, tpu.core_type = #tpu.core_type<tc>, window_params = [{transform_indices = @transform_0, window_bounds = array<i64: 8, 32>}, {transform_indices = @transform_1, window_bounds = array<i64: 8, 48>}, {pipeline_mode = #tpu.pipeline_mode<synchronous>, transform_indices = @transform_2, window_bounds = array<i64: 32, 64>}, {pipeline_mode = #tpu.pipeline_mode<synchronous>, transform_indices = @transform_3, window_bounds = array<i64: 1, 64>}, {pipeline_mode = #tpu.pipeline_mode<synchronous>, transform_indices = @transform_4, window_bounds = array<i64: 48, 64>}, {pipeline_mode = #tpu.pipeline_mode<synchronous>, transform_indices = @transform_5, window_bounds = array<i64: 1, 64>}, {pipeline_mode = #tpu.pipeline_mode<synchronous>, transform_indices = @transform_6, window_bounds = array<i64: 64, 32>}, {pipeline_mode = #tpu.pipeline_mode<synchronous>, transform_indices = @transform_7, window_bounds = array<i64: 2, 32>}, {transform_indices = @transform_8, window_bounds = array<i64: 1>}, {transform_indices = @transform_9, window_bounds = array<i64: 8, 64>}]} {
    %c0 = arith.constant 0 : index
    %c0_0 = arith.constant 0 : index
    %0 = vector.load %arg1[%c0, %c0_0] : memref<8x32xf32, #tpu.memory_space<vmem>>, vector<8x32xf32>
    %c0_1 = arith.constant 0 : index
    %c0_2 = arith.constant 0 : index
    %1 = vector.load %arg3[%c0_1, %c0_2] : memref<32x64xf32, #tpu.memory_space<vmem>>, vector<32x64xf32>
    %cst = arith.constant dense<0.000000e+00> : vector<8x64xf32>
    %2 = tpu.matmul %0, %1, %cst {dimension_numbers = #tpu.dot_dimension_numbers<[1], [0], [0], [1], [0, 0, 1, 1], [], []>, precision = #tpu.contract_precision<fp32>} : vector<8x32xf32>, vector<32x64xf32>, vector<8x64xf32> -> vector<8x64xf32>
    %c0_3 = arith.constant 0 : index
    %c0_4 = arith.constant 0 : index
    %3 = vector.load %arg4[%c0_3, %c0_4] : memref<1x64xf32, #tpu.memory_space<vmem>>, vector<1x64xf32>
    %4 = vector.broadcast %3 : vector<1x64xf32> to vector<8x64xf32>
    %5 = arith.addf %2, %4 : vector<8x64xf32>
    %cst_5 = arith.constant 0.000000e+00 : f32
    %6 = vector.broadcast %cst_5 : f32 to vector<8x64xf32>
    %7 = arith.maximumf %5, %6 : vector<8x64xf32>
    %c0_6 = arith.constant 0 : index
    %c0_7 = arith.constant 0 : index
    %8 = vector.load %arg2[%c0_6, %c0_7] : memref<8x48xf32, #tpu.memory_space<vmem>>, vector<8x48xf32>
    %c0_8 = arith.constant 0 : index
    %c0_9 = arith.constant 0 : index
    %9 = vector.load %arg5[%c0_8, %c0_9] : memref<48x64xf32, #tpu.memory_space<vmem>>, vector<48x64xf32>
    %cst_10 = arith.constant dense<0.000000e+00> : vector<8x64xf32>
    %10 = tpu.matmul %8, %9, %cst_10 {dimension_numbers = #tpu.dot_dimension_numbers<[1], [0], [0], [1], [0, 0, 1, 1], [], []>, precision = #tpu.contract_precision<fp32>} : vector<8x48xf32>, vector<48x64xf32>, vector<8x64xf32> -> vector<8x64xf32>
    %c0_11 = arith.constant 0 : index
    %c0_12 = arith.constant 0 : index
    %11 = vector.load %arg6[%c0_11, %c0_12] : memref<1x64xf32, #tpu.memory_space<vmem>>, vector<1x64xf32>
    %12 = vector.broadcast %11 : vector<1x64xf32> to vector<8x64xf32>
    %13 = arith.addf %10, %12 : vector<8x64xf32>
    %cst_13 = arith.constant 0.000000e+00 : f32
    %14 = vector.broadcast %cst_13 : f32 to vector<8x64xf32>
    %15 = arith.maximumf %13, %14 : vector<8x64xf32>
    %c0_14 = arith.constant 0 : index
    %c0_15 = arith.constant 0 : index
    %16 = vector.load %arg8[%c0_14, %c0_15] : memref<2x32xf32, #tpu.memory_space<vmem>>, vector<1x32xf32>
    %c1 = arith.constant 1 : index
    %c0_16 = arith.constant 0 : index
    %17 = vector.load %arg8[%c1, %c0_16] : memref<2x32xf32, #tpu.memory_space<vmem>>, vector<1x32xf32>
    %c0_17 = arith.constant 0 : index
    %c0_18 = arith.constant 0 : index
    %18 = vector.load %arg7[%c0_17, %c0_18] : memref<64x32xf32, #tpu.memory_space<vmem>>, vector<64x32xf32>
    %cst_19 = arith.constant dense<0.000000e+00> : vector<8x32xf32>
    %19 = tpu.matmul %7, %18, %cst_19 {dimension_numbers = #tpu.dot_dimension_numbers<[1], [0], [0], [1], [0, 0, 1, 1], [], []>, precision = #tpu.contract_precision<fp32>} : vector<8x64xf32>, vector<64x32xf32>, vector<8x32xf32> -> vector<8x32xf32>
    %20 = vector.broadcast %16 : vector<1x32xf32> to vector<8x32xf32>
    %21 = arith.addf %19, %20 : vector<8x32xf32>
    %cst_20 = arith.constant 0.000000e+00 : f32
    %22 = vector.broadcast %cst_20 : f32 to vector<8x32xf32>
    %23 = arith.maximumf %21, %22 : vector<8x32xf32>
    %c0_21 = arith.constant 0 : index
    %c0_22 = arith.constant 0 : index
    %24 = vector.load %arg7[%c0_21, %c0_22] : memref<64x32xf32, #tpu.memory_space<vmem>>, vector<64x32xf32>
    %cst_23 = arith.constant dense<0.000000e+00> : vector<8x32xf32>
    %25 = tpu.matmul %15, %24, %cst_23 {dimension_numbers = #tpu.dot_dimension_numbers<[1], [0], [0], [1], [0, 0, 1, 1], [], []>, precision = #tpu.contract_precision<fp32>} : vector<8x64xf32>, vector<64x32xf32>, vector<8x32xf32> -> vector<8x32xf32>
    %26 = vector.broadcast %16 : vector<1x32xf32> to vector<8x32xf32>
    %27 = arith.addf %25, %26 : vector<8x32xf32>
    %cst_24 = arith.constant 0.000000e+00 : f32
    %28 = vector.broadcast %cst_24 : f32 to vector<8x32xf32>
    %29 = arith.maximumf %27, %28 : vector<8x32xf32>
    %c0_25 = arith.constant 0 : index
    %30 = memref.load %arg9[%c0_25] : memref<1xf32, #tpu.memory_space<smem>>
    %31 = vector.broadcast %17 : vector<1x32xf32> to vector<8x32xf32>
    %32 = arith.mulf %23, %31 : vector<8x32xf32>
    %cst_26 = arith.constant dense<0.000000e+00> : vector<8xf32>
    %33 = vector.multi_reduction <add>, %32, %cst_26 [1] : vector<8x32xf32> to vector<8xf32>
    %34 = vector.shape_cast %33 : vector<8xf32> to vector<8x1xf32>
    %35 = vector.broadcast %30 : f32 to vector<8x1xf32>
    %36 = arith.addf %34, %35 : vector<8x1xf32>
    %37 = vector.broadcast %17 : vector<1x32xf32> to vector<8x32xf32>
    %38 = arith.mulf %29, %37 : vector<8x32xf32>
    %cst_27 = arith.constant dense<0.000000e+00> : vector<8xf32>
    %39 = vector.multi_reduction <add>, %38, %cst_27 [1] : vector<8x32xf32> to vector<8xf32>
    %40 = vector.shape_cast %39 : vector<8xf32> to vector<8x1xf32>
    %41 = vector.broadcast %30 : f32 to vector<8x1xf32>
    %42 = arith.addf %40, %41 : vector<8x1xf32>
    %43 = vector.broadcast %36 : vector<8x1xf32> to vector<8x64xf32>
    %44 = arith.mulf %7, %43 : vector<8x64xf32>
    %45 = vector.broadcast %42 : vector<8x1xf32> to vector<8x64xf32>
    %46 = arith.mulf %15, %45 : vector<8x64xf32>
    %47 = arith.addf %44, %46 : vector<8x64xf32>
    %c0_28 = arith.constant 0 : index
    %c0_29 = arith.constant 0 : index
    %48 = vector.load %arg10[%c0_28, %c0_29] : memref<8x64xf32, #tpu.memory_space<vmem>>, vector<8x64xf32>
    tpu.vector_store %arg10[%c0_28, %c0_29], %47 {strides = array<i32>} : memref<8x64xf32, #tpu.memory_space<vmem>>, vector<8x64xf32>,
    return
  }
  func.func @transform_0(%arg0: i32) -> (i32, i32) {
    %c0_i32 = arith.constant 0 : i32
    %c0_i32_0 = arith.constant 0 : i32
    return %arg0, %c0_i32 : i32, i32
  }
  func.func @transform_1(%arg0: i32) -> (i32, i32) {
    %c0_i32 = arith.constant 0 : i32
    %c0_i32_0 = arith.constant 0 : i32
    return %arg0, %c0_i32 : i32, i32
  }
  func.func @transform_2(%arg0: i32) -> (i32, i32) {
    %c0_i32 = arith.constant 0 : i32
    %c0_i32_0 = arith.constant 0 : i32
    %c0_i32_1 = arith.constant 0 : i32
    return %c0_i32, %c0_i32_0 : i32, i32
  }
  func.func @transform_3(%arg0: i32) -> (i32, i32) {
    %c0_i32 = arith.constant 0 : i32
    %c0_i32_0 = arith.constant 0 : i32
    %c0_i32_1 = arith.constant 0 : i32
    return %c0_i32, %c0_i32_0 : i32, i32
  }
  func.func @transform_4(%arg0: i32) -> (i32, i32) {
    %c0_i32 = arith.constant 0 : i32
    %c0_i32_0 = arith.constant 0 : i32
    %c0_i32_1 = arith.constant 0 : i32
    return %c0_i32, %c0_i32_0 : i32, i32
  }
  func.func @transform_5(%arg0: i32) -> (i32, i32) {
    %c0_i32 = arith.constant 0 : i32
    %c0_i32_0 = arith.constant 0 : i32
    %c0_i32_1 = arith.constant 0 : i32
    return %c0_i32, %c0_i32_0 : i32, i32
  }
  func.func @transform_6(%arg0: i32) -> (i32, i32) {
    %c0_i32 = arith.constant 0 : i32
    %c0_i32_0 = arith.constant 0 : i32
    %c0_i32_1 = arith.constant 0 : i32
    return %c0_i32, %c0_i32_0 : i32, i32
  }
  func.func @transform_7(%arg0: i32) -> (i32, i32) {
    %c0_i32 = arith.constant 0 : i32
    %c0_i32_0 = arith.constant 0 : i32
    %c0_i32_1 = arith.constant 0 : i32
    return %c0_i32, %c0_i32_0 : i32, i32
  }
  func.func @transform_8(%arg0: i32) -> i32 {
    %c0_i32 = arith.constant 0 : i32
    %c0_i32_0 = arith.constant 0 : i32
    return %c0_i32 : i32
  }
  func.func @transform_9(%arg0: i32) -> (i32, i32) {
    %c0_i32 = arith.constant 0 : i32
    %c0_i32_0 = arith.constant 0 : i32
    return %arg0, %c0_i32 : i32, i32
  }
}

</mosaic_0001>

<bundles_post_ra>
// kernel: tpu_custom_call.1
= control target key start
LH: loop header
LB: loop body
LE: loop exit
PB: predicated region body
PF: predicated region fallthrough
CT: control target
= control target key end

     0   :  { %v3070_v3 = vmov 0.0|0.0   ;;  %vm3071_vm0 = vmmov 0   ;;  %v3072_v8 = vmov 0.0   ;;  %vm46_vm1 = vcmask 261120   ;;  %s3636_s0 = inlined_call_operand.vmem [shape: f32[8,32], index: 0, kind: input, shape index: {}]   ;;  %s3637_s1 = inlined_call_operand.vmem [shape: f32[8,48], index: 1, kind: input, shape index: {}]   ;;  %s3638_s2 = inlined_call_operand.vmem [shape: f32[32,64], index: 2, kind: input, shape index: {}]   ;;  %s3639_s3 = inlined_call_operand.vmem [shape: f32[1,64], index: 3, kind: input, shape index: {}]   ;;  %s3640_s4 = inlined_call_operand.vmem [shape: f32[48,64], index: 4, kind: input, shape index: {}]   ;;  %s3641_s5 = inlined_call_operand.vmem [shape: f32[1,64], index: 5, kind: input, shape index: {}]   ;;  %s3642_s6 = inlined_call_operand.vmem [shape: f32[64,32], index: 6, kind: input, shape index: {}]   ;;  %s3643_s7 = inlined_call_operand.vmem [shape: f32[2,32], index: 7, kind: input, shape index: {}]   ;;  %s3644_s8 = inlined_call_operand.<no memory space> [shape: f32[1], index: 8, kind: input, shape index: {}]   ;;  %s3645_s9 = inlined_call_operand.hbm [shape: f32[8,64], index: 9, kind: output, shape index: {}]  }
   0x1   :  { %v35_v0 = vld [vmem:[%s3638_s2] sm:$0xff]  ;;  %v36_v1 = vld [vmem:[%s3638_s2 + $0x8] sm:$0xff]  ;;  %v37_v2 = vld [vmem:[%s3638_s2 + $0x10] sm:$0xff]  ;;  %2765 = vmatprep.subr.bf16.mxu0 %v3070_v3  ;;  %2389 = vmatprep.mubr.msk.f32.mxu0 %vm3071_vm0, %v3072_v8 }
   0x2   :  { %v51_v4 = vand.u32 4294901760, %v35_v0  ;;  %v54_v5 = vand.u32 4294901760, %v36_v1  ;;  %v38_v6 = vld [vmem:[%s3638_s2 + $0x18] sm:$0xff]  ;;  %v57_v7 = vand.u32 4294901760, %v37_v2  ;;  %v34_v9 = vld [vmem:[%s3636_s0] sm:$0xff]  ;;  %2810 = vmatprep.subr.bf16.mxu1 %v3070_v3  ;;  %v3152_v13 = vld [vmem:[%s3640_s4 + $0x8] sm:$0xff]  ;;  %2474 = vmatprep.mubr.msk.f32.mxu1 %vm3071_vm0, %v3072_v8 }
   0x3   :  { %v60_v10 = vand.u32 4294901760, %v38_v6  ;;  %v48_v11 = vsel %vm46_vm1, %v34_v9, 0  ;;  %v3147_v12 = vld [vmem:[%s3640_s4] sm:$0xff]  ;;  %v3167_v18 = vld [vmem:[%s3640_s4 + $0x10] sm:$0xff]  ;;  %v3179_v23 = vld [vmem:[%s3640_s4 + $0x18] sm:$0xff]  ;;  %v558_v26 = vand.u32 4294901760, %v3152_v13 }
   0x4   :  { %v3156_v14 = vpack.c.bf16 %v54_v5, %v51_v4  ;;  %v3158_v15 = vsub.f32 %v35_v0, %v51_v4  ;;  %v3160_v16 = vsub.f32 %v36_v1, %v54_v5  ;;  %v3162_v17 = vsub.f32 %v37_v2, %v57_v7 }
   0x5   :  { %v3169_v19 = vpack.c.bf16 %v60_v10, %v57_v7  ;;  %v3171_v20 = vsub.f32 %v38_v6, %v60_v10  ;;  %v3173_v21 = vand.u32 4294901760, %v48_v11  ;;  %v555_v22 = vand.u32 4294901760, %v3147_v12 }
   0x6   :  { %2767 = vmatpush3.bf16.msra.mxu0 %v3156_v14  ;;  %v132_v24 = vand.u32 4294901760, %v3158_v15  ;;  %v139_v25 = vand.u32 4294901760, %v3160_v16  ;;  %v146_v27 = vand.u32 4294901760, %v3162_v17 }
   0x7   :  { %15 = vsyncpa [#allocation4], 0  ;;  %2768 = vmatprep.subr.bf16.mxu0 %v3070_v3  ;;  %v3188_v28 = vsub.f32 %v48_v11, %v3173_v21  ;;  %v3193_v29 = vsub.f32 %v3147_v12, %v555_v22  ;;  %v153_v30 = vand.u32 4294901760, %v3171_v20  ;;  %v561_v31 = vand.u32 4294901760, %v3167_v18  ;;  %v3234_v48 = vld [vmem:[%s3640_s4 + $0x20] sm:$0xff]  ;;  %v3239_v49 = vld [vmem:[%s3640_s4 + $0x28] sm:$0xff] }
   0x8   :  { %v133_v32 = vsub.f32 %v3158_v15, %v132_v24  ;;  %v140_v33 = vsub.f32 %v3160_v16, %v139_v25  ;;  %v3206_v34 = vsub.f32 %v3152_v13, %v558_v26  ;;  %v147_v35 = vsub.f32 %v3162_v17, %v146_v27  ;;  %v536_v11 = vld [vmem:[%s3637_s1] sm:$0xff] }
   0x9   :  { %v121_v36 = vand.u32 4294901760, %v3188_v28  ;;  %v638_v37 = vand.u32 4294901760, %v3193_v29  ;;  %v154_v38 = vsub.f32 %v3171_v20, %v153_v30  ;;  %v564_v39 = vand.u32 4294901760, %v3179_v23 }
   0xa   :  { %2770 = vmatpush3.bf16.msra.mxu0 %v3169_v19  ;;  %v134_v40 = vand.u32 4294901760, %v133_v32  ;;  %v141_v41 = vand.u32 4294901760, %v140_v33  ;;  %v645_v42 = vand.u32 4294901760, %v3206_v34  ;;  %v148_v43 = vand.u32 4294901760, %v147_v35 }
   0xb   :  { %v122_v44 = vsub.f32 %v3188_v28, %v121_v36  ;;  %2771 = vmatprep.subr.bf16.mxu0 %v3070_v3  ;;  %v639_v45 = vsub.f32 %v3193_v29, %v638_v37  ;;  %v155_v46 = vand.u32 4294901760, %v154_v38  ;;  %v3229_v47 = vsub.f32 %v3167_v18, %v561_v31 }
   0xc   :  { %v2772_v50 = vpack.c.bf16 %v141_v41, %v134_v40  ;;  %v646_v51 = vsub.f32 %v3206_v34, %v645_v42  ;;  %v3247_v52 = vsub.f32 %v3179_v23, %v564_v39  ;;  %v567_v58 = vand.u32 4294901760, %v3234_v48 }
   0xd   :  { %v123_v53 = vand.u32 4294901760, %v122_v44  ;;  %v640_v54 = vand.u32 4294901760, %v639_v45  ;;  %v652_v55 = vand.u32 4294901760, %v3229_v47  ;;  %v570_v59 = vand.u32 4294901760, %v3239_v49 }
   0xe   :  { %v647_v56 = vand.u32 4294901760, %v646_v51  ;;  %v659_v57 = vand.u32 4294901760, %v3247_v52  ;;  %v2775_v60 = vpack.c.bf16 %v155_v46, %v148_v43  ;;  %v3264_v0 = vsub.f32 %v3234_v48, %v567_v58  ;;  %v1074_v48 = vld [vmem:[%s3642_s6 + $0x30] sm:$0xff] }
   0xf   :  { %2390 = vmatmul.mubr.f32.vlgmr.msra.gmra.mrb[0].mxu0 %v123_v53  ;;  %v653_v61 = vsub.f32 %v3229_v47, %v652_v55  ;;  %v3270_v2 = vsub.f32 %v3239_v49, %v570_v59  ;;  %v2778_v9 = vpack.c.bf16 %v3160_v16, %v3158_v15  ;;  %vm550_vm2 = vcmask 392192   ;;  %v1075_v49 = vld [vmem:[%s3642_s6 + $0x38] sm:$0xff] }
  0x10   :  { %2773 = vmatpush3.bf16.msra.mxu0 %v2772_v50  ;;  %v2811_v62 = vpack.c.bf16 %v647_v56, %v640_v54  ;;  %v660_v63 = vsub.f32 %v3247_v52, %v659_v57  ;;  %2400 = vmatprep.mubr.msk.f32.mxu0 %vm3071_vm0, %v3072_v8  ;;  %v666_v5 = vand.u32 4294901760, %v3264_v0  ;;  %v552_v38 = vsel %vm550_vm2, %v536_v11, 0 }
  0x11   :  { %2774 = vmatprep.subr.bf16.mxu0 %v3070_v3  ;;  %v654_v1 = vand.u32 4294901760, %v653_v61  ;;  %v673_v6 = vand.u32 4294901760, %v3270_v2  ;;  %v2781_v40 = vpack.c.bf16 %v3171_v20, %v3162_v17  ;;  %v3294_v43 = vand.u32 4294901760, %v552_v38 }
  0x12   :  { %2812 = vmatpush3.bf16.msra.mxu1 %v2811_v62  ;;  %v661_v4 = vand.u32 4294901760, %v660_v63  ;;  %v667_v10 = vsub.f32 %v3264_v0, %v666_v5  ;;  %v2820_v44 = vpack.c.bf16 %v3206_v34, %v3193_v29  ;;  %v2823_v45 = vpack.c.bf16 %v3247_v52, %v3229_v47  ;;  %v1073_v34 = vld [vmem:[%s3642_s6 + $0x28] sm:$0xff] }
  0x13   :  { %2813 = vmatprep.subr.bf16.mxu1 %v3070_v3  ;;  %v674_v32 = vsub.f32 %v3270_v2, %v673_v6  ;;  %v2826_v46 = vpack.c.bf16 %v3270_v2, %v3264_v0  ;;  %v2790_v50 = vpack.c.bf16 %v139_v25, %v132_v24  ;;  %v626_v51 = vsub.f32 %v552_v38, %v3294_v43 }
  0x14   :  { %2776 = vmatpush3.bf16.msra.mxu0 %v2775_v60  ;;  %v2814_v7 = vpack.c.bf16 %v661_v4, %v654_v1  ;;  %v668_v33 = vand.u32 4294901760, %v667_v10  ;;  %v2802_v53 = vpack.c.bf16 %v558_v26, %v555_v22  ;;  %v2793_v15 = vpack.c.bf16 %v153_v30, %v146_v27  ;;  %v1069_v22 = vld [vmem:[%s3642_s6 + $0x8] sm:$0xff]  ;;  %v1070_v26 = vld [vmem:[%s3642_s6 + $0x10] sm:$0xff]  ;;  %v1071_v27 = vld [vmem:[%s3642_s6 + $0x18] sm:$0xff] }
  0x15   :  { %2777 = vmatprep.subr.bf16.mxu0 %v3070_v3  ;;  %v675_v35 = vand.u32 4294901760, %v674_v32  ;;  %v2805_v12 = vpack.c.bf16 %v564_v39, %v561_v31  ;;  %v2808_v13 = vpack.c.bf16 %v570_v59, %v567_v58  ;;  %v627_v16 = vand.u32 4294901760, %v626_v51  ;;  %v1072_v31 = vld [vmem:[%s3642_s6 + $0x20] sm:$0xff] }
  0x16   :  { %2815 = vmatpush3.bf16.msra.mxu1 %v2814_v7  ;;  %v2838_v17 = vpack.c.bf16 %v645_v42, %v638_v37  ;;  %v2844_v18 = vpack.c.bf16 %v673_v6, %v666_v5  ;;  %v1088_v24 = vand.u32 4294901760, %v1069_v22  ;;  %v1094_v29 = vand.u32 4294901760, %v1071_v27 }
  0x17   :  { %2401 = vmatmul.mubr.f32.vlgmr.msra.gmra.mrb[0].mxu0 %v3173_v21  ;;  %2816 = vmatprep.subr.bf16.mxu1 %v3070_v3  ;;  %v2817_v41 = vpack.c.bf16 %v675_v35, %v668_v33  ;;  %v1100_v37 = vand.u32 4294901760, %v1073_v34  ;;  %v1103_v52 = vand.u32 4294901760, %v1074_v48  ;;  %v1106_v54 = vand.u32 4294901760, %v1075_v49 }
  0x18   :  { %2779 = vmatpush3.bf16.msra.mxu0 %v2778_v9  ;;  %2411 = vmatprep.mubr.msk.f32.mxu0 %vm3071_vm0, %v3072_v8  ;;  %v1176_v47 = vsub.f32 %v1069_v22, %v1088_v24  ;;  %v1190_v61 = vsub.f32 %v1071_v27, %v1094_v29  ;;  %vm1080_vm3 = vcmask 523264  }
  0x19   :  { %2780 = vmatprep.subr.bf16.mxu0 %v3070_v3  ;;  %v1204_v6 = vsub.f32 %v1073_v34, %v1100_v37  ;;  %v1211_v38 = vsub.f32 %v1074_v48, %v1103_v52 }
  0x1a   :  { %2818 = vmatpush3.bf16.msra.mxu1 %v2817_v41  ;;  %v1177_v56 = vand.u32 4294901760, %v1176_v47  ;;  %v1191_v1 = vand.u32 4294901760, %v1190_v61 }
  0x1b   :  { %2819 = vmatprep.subr.bf16.mxu1 %v3070_v3  ;;  %v1205_v11 = vand.u32 4294901760, %v1204_v6 }
  0x1c   :  { %2782 = vmatpush3.bf16.msra.mxu0 %v2781_v40  ;;  %v1178_v59 = vsub.f32 %v1176_v47, %v1177_v56  ;;  %v1192_v7 = vsub.f32 %v1190_v61, %v1191_v1  ;;  %v1218_v40 = vsub.f32 %v1075_v49, %v1106_v54  ;;  %v2198_v49 = vld [vmem:[%s3641_s5] ss:$0 sm:$0xff] }
  0x1d   :  { %2783 = vmatprep.subr.bf16.mxu0 %v3070_v3  ;;  %2475 = vmatmul.mubr.f32.vlgmr.msra.gmra.mrb[0].mxu1 %v3294_v43  ;;  %v1206_v35 = vsub.f32 %v1204_v6, %v1205_v11 }
  0x1e   :  { %2821 = vmatpush3.bf16.msra.mxu1 %v2820_v44  ;;  %2489 = vmatprep.mubr.msk.f32.mxu1 %vm3071_vm0, %v3072_v8  ;;  %v1179_v63 = vand.u32 4294901760, %v1178_v59  ;;  %v1193_v32 = vand.u32 4294901760, %v1192_v7 }
  0x1f   :  { %2412 = vmatmul.mubr.f32.vlgmr.msra.gmra.mrb[0].mxu0 %v3188_v28  ;;  %2822 = vmatprep.subr.bf16.mxu1 %v3070_v3  ;;  %v1091_v28 = vand.u32 4294901760, %v1070_v26  ;;  %v1207_v44 = vand.u32 4294901760, %v1206_v35 }
  0x20   :  { %2785 = vmatpush3.bf16.msra.mxu0 %v3156_v14  ;;  %2422 = vmatprep.mubr.msk.f32.mxu0 %vm3071_vm0, %v3072_v8 }
  0x21   :  { %2786 = vmatprep.subr.bf16.mxu0 %v3070_v3  ;;  %v3408_v30 = vpack.c.bf16 %v1094_v29, %v1091_v28  ;;  %v1183_v60 = vsub.f32 %v1070_v26, %v1091_v28 }
  0x22   :  { %2824 = vmatpush3.bf16.msra.mxu1 %v2823_v45  ;;  %v1212_v45 = vand.u32 4294901760, %v1211_v38 }
  0x23   :  { %2825 = vmatprep.subr.bf16.mxu1 %v3070_v3  ;;  %v1184_v0 = vand.u32 4294901760, %v1183_v60 }
  0x24   :  { %2788 = vmatpush3.bf16.msra.mxu0 %v3169_v19 }
  0x25   :  { %2789 = vmatprep.subr.bf16.mxu0 %v3070_v3  ;;  %v1185_v4 = vsub.f32 %v1183_v60, %v1184_v0 }
  0x26   :  { %2827 = vmatpush3.bf16.msra.mxu1 %v2826_v46  ;;  %v1219_v46 = vand.u32 4294901760, %v1218_v40 }
  0x27   :  { %2423 = vmatmul.mubr.f32.vlgmr.msra.gmra.mrb[0].mxu0 %v121_v36  ;;  %2828 = vmatprep.subr.bf16.mxu1 %v3070_v3  ;;  %v1097_v36 = vand.u32 4294901760, %v1072_v31  ;;  %v1186_v9 = vand.u32 4294901760, %v1185_v4 }
  0x28   :  { %2791 = vmatpush3.bf16.msra.mxu0 %v2790_v50  ;;  %2433 = vmatprep.mubr.msk.f32.mxu0 %vm3071_vm0, %v3072_v8  ;;  %v3460_v22 = vpack.c.bf16 %v1219_v46, %v1212_v45 }
  0x29   :  { %2792 = vmatprep.subr.bf16.mxu0 %v3070_v3  ;;  %2490 = vmatmul.mubr.f32.vlgmr.msra.gmra.mrb[0].mxu1 %v626_v51  ;;  %v3420_v39 = vpack.c.bf16 %v1100_v37, %v1097_v36  ;;  %v1197_v5 = vsub.f32 %v1072_v31, %v1097_v36  ;;  %v3440_v41 = vpack.c.bf16 %v1193_v32, %v1186_v9 }
  0x2a   :  { %2830 = vmatpush3.bf16.msra.mxu1 %v2802_v53  ;;  %2504 = vmatprep.mubr.msk.f32.mxu1 %vm3071_vm0, %v3072_v8 }
  0x2b   :  { %2831 = vmatprep.subr.bf16.mxu1 %v3070_v3  ;;  %v1198_v10 = vand.u32 4294901760, %v1197_v5 }
  0x2c   :  { %2794 = vmatpush3.bf16.msra.mxu0 %v2793_v15 }
  0x2d   :  { %2795 = vmatprep.subr.bf16.mxu0 %v3070_v3  ;;  %v1199_v33 = vsub.f32 %v1197_v5, %v1198_v10 }
  0x2e   :  { %2833 = vmatpush3.bf16.msra.mxu1 %v2805_v12 }
  0x2f   :  { %2434 = vmatmul.mubr.f32.vlgmr.msra.gmra.mrb[0].mxu0 %v3173_v21  ;;  %2834 = vmatprep.subr.bf16.mxu1 %v3070_v3 }
  0x30   :  { %2797 = vmatpush3.bf16.msra.mxu0 %v3156_v14  ;;  %2444 = vmatprep.mubr.msk.f32.mxu0 %vm3071_vm0, %v3072_v8  ;;  %v2841_v14 = vpack.c.bf16 %v659_v57, %v652_v55  ;;  %v3432_v57 = vpack.c.bf16 %v1106_v54, %v1103_v52 }
  0x31   :  { %2798 = vmatprep.subr.bf16.mxu0 %v3070_v3 }
  0x32   :  { %2836 = vmatpush3.bf16.msra.mxu1 %v2808_v13 }
  0x33   :  { %2837 = vmatprep.subr.bf16.mxu1 %v3070_v3 }
  0x34   :  { %2800 = vmatpush3.bf16.msra.mxu0 %v3169_v19  ;;  %v628_v19 = vsub.f32 %v626_v51, %v627_v16  ;;  %v1213_v51 = vsub.f32 %v1211_v38, %v1212_v45 }
  0x35   :  { %2801 = vmatprep.subr.bf16.mxu0 %v3070_v3  ;;  %2505 = vmatmul.mubr.f32.vlgmr.msra.gmra.mrb[0].mxu1 %v627_v16 }
  0x36   :  { %2839 = vmatpush3.bf16.msra.mxu1 %v2838_v17  ;;  %2519 = vmatprep.mubr.msk.f32.mxu1 %vm3071_vm0, %v3072_v8  ;;  %v629_v20 = vand.u32 4294901760, %v628_v19  ;;  %v1214_v15 = vand.u32 4294901760, %v1213_v51  ;;  %v3448_v17 = vpack.c.bf16 %v1190_v61, %v1183_v60 }
  0x37   :  { %2445 = vmatmul.mubr.f32.vlgmr.msra.gmra.mrb[0].mxu0 %v3173_v21  ;;  %2840 = vmatprep.subr.bf16.mxu1 %v3070_v3  ;;  %v1068_v21 = vld [vmem:[%s3642_s6] sm:$0xff] }
  0x38   :  { %2803 = vmatpush3.bf16.msra.mxu0 %v2802_v53  ;;  %2459 = vmatprep.mubr.msk.f32.mxu0 %vm3071_vm0, %v3072_v8  ;;  %v1085_v23 = vand.u32 4294901760, %v1068_v21 }
  0x39   :  { %2804 = vmatprep.subr.bf16.mxu0 %v3070_v3 }
  0x3a   :  { %2842 = vmatpush3.bf16.msra.mxu1 %v2841_v14  ;;  %v3396_v25 = vpack.c.bf16 %v1088_v24, %v1085_v23  ;;  %v1169_v42 = vsub.f32 %v1068_v21, %v1085_v23  ;;  %v3450_v14 = vpack.c.bf16 %v1204_v6, %v1197_v5  ;;  %v3458_v21 = vpack.c.bf16 %v1205_v11, %v1198_v10  ;;  %v2197_v23 = vld [vmem:[%s3639_s3] ss:$0 sm:$0xff] }
  0x3b   :  { %2843 = vmatprep.subr.bf16.mxu1 %v3070_v3  ;;  %v2172_v11 = vstv %s3644_s8 }
  0x3c   :  { %2806 = vmatpush3.bf16.msra.mxu0 %v2805_v12  ;;  %v1170_v55 = vand.u32 4294901760, %v1169_v42  ;;  %v3446_v16 = vpack.c.bf16 %v1176_v47, %v1169_v42 }
  0x3d   :  { %2807 = vmatprep.subr.bf16.mxu0 %v3070_v3 }
  0x3e   :  { %2845 = vmatpush3.bf16.msra.mxu1 %v2844_v18  ;;  %v1171_v58 = vsub.f32 %v1169_v42, %v1170_v55  ;;  %v3452_v18 = vpack.c.bf16 %v1218_v40, %v1211_v38  ;;  %v3454_v19 = vpack.c.bf16 %v1177_v56, %v1170_v55 }
  0x3f   :  { %2846 = vmatprep.subr.bf16.mxu1 %v3070_v3 }
  0x40   :  { %2809 = vmatpush3.bf16.msra.mxu0 %v2808_v13  ;;  %v1172_v62 = vand.u32 4294901760, %v1171_v58 }
  0x41   :  { %2855 = vmatprep.subr.bf16.mxu0 %v3070_v3  ;;  %2520 = vmatmul.mubr.f32.vlgmr.msra.gmra.mrb[0].mxu1 %v3294_v43 }
  0x42   :  { %2848 = vmatpush3.bf16.msra.mxu1 %v2802_v53  ;;  %2534 = vmatprep.mubr.msk.f32.mxu1 %vm3071_vm0, %v3072_v8  ;;  %v3438_v2 = vpack.c.bf16 %v1179_v63, %v1172_v62  ;;  %v1220_v53 = vsub.f32 %v1218_v40, %v1219_v46 }
  0x43   :  { %2460 = vmatmul.mubr.f32.vlgmr.msra.gmra.mrb[2].mxu0 %v629_v20  ;;  %2849 = vmatprep.subr.bf16.mxu1 %v3070_v3  ;;  %v3456_v20 = vpack.c.bf16 %v1191_v1, %v1184_v0 }
  0x44   :  { %2553 = vmatprep.mubr.msk.f32.mxu0 %vm3071_vm0, %v3072_v8  ;;  %2857 = vmatpush3.bf16.msra.mxu0 %v3396_v25 }
  0x45   :  { %2858 = vmatprep.subr.bf16.mxu0 %v3070_v3 }
  0x46   :  { %2851 = vmatpush3.bf16.msra.mxu1 %v2805_v12  ;;  %v1221_v12 = vand.u32 4294901760, %v1220_v53 }
  0x47   :  { %2852 = vmatprep.subr.bf16.mxu1 %v3070_v3 }
  0x48   :  { %2860 = vmatpush3.bf16.msra.mxu0 %v3408_v30 }
  0x49   :  { %2861 = vmatprep.subr.bf16.mxu0 %v3070_v3 }
  0x4a   :  { %2854 = vmatpush3.bf16.msra.mxu1 %v2808_v13  ;;  %v3444_v13 = vpack.c.bf16 %v1221_v12, %v1214_v15 }
  0x4b   :  { %2927 = vmatprep.subr.bf16.mxu1 %v3070_v3 }
  0x4c   :  { %2863 = vmatpush3.bf16.msra.mxu0 %v3420_v39 }
  0x4d   :  { %2535 = vmatmul.mubr.f32.vlgmr.msra.gmra.mrb[0].mxu1 %v3294_v43  ;;  %2864 = vmatprep.subr.bf16.mxu0 %v3070_v3  ;;  %v1200_v43 = vand.u32 4294901760, %v1199_v33 }
  0x4e   :  { %2667 = vmatprep.mubr.msk.f32.mxu1 %vm3071_vm0, %v3072_v8  ;;  %2929 = vmatpush3.bf16.msra.mxu1 %v3396_v25 }
  0x4f   :  { %2930 = vmatprep.subr.bf16.mxu1 %v3070_v3  ;;  %v3442_v50 = vpack.c.bf16 %v1207_v44, %v1200_v43 }
  0x50   :  { %2866 = vmatpush3.bf16.msra.mxu0 %v3432_v57 }
  0x51   :  { %2867 = vmatprep.subr.bf16.mxu0 %v3070_v3 }
  0x52   :  { %2932 = vmatpush3.bf16.msra.mxu1 %v3408_v30 }
  0x53   :  { %2933 = vmatprep.subr.bf16.mxu1 %v3070_v3 }
  0x56   :  { %2935 = vmatpush3.bf16.msra.mxu1 %v3420_v39 }
  0x57   :  { %2936 = vmatprep.subr.bf16.mxu1 %v3070_v3 }
  0x5a   :  { %2938 = vmatpush3.bf16.msra.mxu1 %v3432_v57 }
  0x5b   :  { %2939 = vmatprep.subr.bf16.mxu1 %v3070_v3 }
 0x10a   :  { %v531_v24 = vpop.f32.mrb[0].mxu0 }
 0x10b   :  { %v3465_v26 = vadd.f32 %v2197_v23, %v531_v24  ;;  %v2446_v27 = vpop.f32.mrb[1].mxu0 }
 0x10d   :  { %v535_v28 = vmax.f32 %v3465_v26, 0.0 }
 0x10f   :  { %v1082_v29 = vsel %vm1080_vm3, %v535_v28, 0 }
 0x110   :  { %v3471_v31 = vand.u32 4294901760, %v1082_v29 }
 0x112   :  { %v3474_v34 = vsub.f32 %v1082_v29, %v3471_v31 }
 0x114   :  { %v1159_v36 = vand.u32 4294901760, %v3474_v34 }
 0x116   :  { %v1160_v37 = vsub.f32 %v3474_v34, %v1159_v36  ;;  %v631_v42 = vpop.f32.mrb[2].mxu0 }
 0x117   :  { %v2461_v47 = vpop.f32.mrb[3].mxu0  ;;  %v632_v52 = vadd.f32 %v2198_v49, %v631_v42 }
 0x118   :  { %v1161_v48 = vand.u32 4294901760, %v1160_v37 }
 0x11a   :  { %2554 = vmatmul.mubr.f32.vlgmr.msra.gmra.mrb[4].mxu0 %v1161_v48 }
 0x11b   :  { %2869 = vmatpush3.bf16.msra.mxu0 %v3438_v2  ;;  %2572 = vmatprep.mubr.msk.f32.mxu0 %vm3071_vm0, %v3072_v8 }
 0x11c   :  { %2870 = vmatprep.subr.bf16.mxu0 %v3070_v3 }
 0x11f   :  { %2872 = vmatpush3.bf16.msra.mxu0 %v3440_v41 }
 0x120   :  { %2873 = vmatprep.subr.bf16.mxu0 %v3070_v3  ;;  %v1061_v54 = vpop.f32.mrb[0].mxu1 }
 0x121   :  { %v3489_v55 = vadd.f32 %v1061_v54, %v632_v52  ;;  %v2536_v56 = vpop.f32.mrb[1].mxu1 }
 0x123   :  { %2875 = vmatpush3.bf16.msra.mxu0 %v3442_v50  ;;  %v1065_v58 = vmax.f32 %v3489_v55, 0.0 }
 0x124   :  { %2876 = vmatprep.subr.bf16.mxu0 %v3070_v3 }
 0x125   :  { %v1623_v59 = vsel %vm1080_vm3, %v1065_v58, 0 }
 0x126   :  { %v3497_v60 = vand.u32 4294901760, %v1623_v59 }
 0x127   :  { %2878 = vmatpush3.bf16.msra.mxu0 %v3444_v13 }
 0x128   :  { %2879 = vmatprep.subr.bf16.mxu0 %v3070_v3  ;;  %v3502_v61 = vsub.f32 %v1623_v59, %v3497_v60 }
 0x12a   :  { %2573 = vmatmul.mubr.f32.vlgmr.msra.gmra.mrb[4].mxu0 %v3471_v31  ;;  %v1700_v62 = vand.u32 4294901760, %v3502_v61 }
 0x12b   :  { %2881 = vmatpush3.bf16.msra.mxu0 %v3446_v16  ;;  %2591 = vmatprep.mubr.msk.f32.mxu0 %vm3071_vm0, %v3072_v8 }
 0x12c   :  { %2882 = vmatprep.subr.bf16.mxu0 %v3070_v3  ;;  %v1701_v63 = vsub.f32 %v3502_v61, %v1700_v62 }
 0x12e   :  { %v1702_v0 = vand.u32 4294901760, %v1701_v63 }
 0x12f   :  { %2884 = vmatpush3.bf16.msra.mxu0 %v3448_v17 }
 0x130   :  { %2885 = vmatprep.subr.bf16.mxu0 %v3070_v3  ;;  %2668 = vmatmul.mubr.f32.vlgmr.msra.gmra.mrb[2].mxu1 %v1702_v0 }
 0x131   :  { %2941 = vmatpush3.bf16.msra.mxu1 %v3438_v2  ;;  %2686 = vmatprep.mubr.msk.f32.mxu1 %vm3071_vm0, %v3072_v8 }
 0x132   :  { %2942 = vmatprep.subr.bf16.mxu1 %v3070_v3 }
 0x133   :  { %2887 = vmatpush3.bf16.msra.mxu0 %v3450_v14 }
 0x134   :  { %2888 = vmatprep.subr.bf16.mxu0 %v3070_v3 }
 0x135   :  { %2944 = vmatpush3.bf16.msra.mxu1 %v3440_v41 }
 0x136   :  { %2945 = vmatprep.subr.bf16.mxu1 %v3070_v3 }
 0x137   :  { %2890 = vmatpush3.bf16.msra.mxu0 %v3452_v18 }
 0x138   :  { %2891 = vmatprep.subr.bf16.mxu0 %v3070_v3 }
 0x139   :  { %2947 = vmatpush3.bf16.msra.mxu1 %v3442_v50 }
 0x13a   :  { %2592 = vmatmul.mubr.f32.vlgmr.msra.gmra.mrb[4].mxu0 %v3474_v34  ;;  %2948 = vmatprep.subr.bf16.mxu1 %v3070_v3 }
 0x13b   :  { %2893 = vmatpush3.bf16.msra.mxu0 %v3396_v25  ;;  %2610 = vmatprep.mubr.msk.f32.mxu0 %vm3071_vm0, %v3072_v8 }
 0x13c   :  { %2894 = vmatprep.subr.bf16.mxu0 %v3070_v3 }
 0x13d   :  { %2950 = vmatpush3.bf16.msra.mxu1 %v3444_v13 }
 0x13e   :  { %2951 = vmatprep.subr.bf16.mxu1 %v3070_v3 }
 0x13f   :  { %2896 = vmatpush3.bf16.msra.mxu0 %v3408_v30 }
 0x140   :  { %2897 = vmatprep.subr.bf16.mxu0 %v3070_v3  ;;  %2687 = vmatmul.mubr.f32.vlgmr.msra.gmra.mrb[2].mxu1 %v3497_v60 }
 0x141   :  { %2953 = vmatpush3.bf16.msra.mxu1 %v3446_v16  ;;  %2705 = vmatprep.mubr.msk.f32.mxu1 %vm3071_vm0, %v3072_v8 }
 0x142   :  { %2954 = vmatprep.subr.bf16.mxu1 %v3070_v3 }
 0x143   :  { %2899 = vmatpush3.bf16.msra.mxu0 %v3420_v39 }
 0x144   :  { %2900 = vmatprep.subr.bf16.mxu0 %v3070_v3 }
 0x145   :  { %2956 = vmatpush3.bf16.msra.mxu1 %v3448_v17 }
 0x146   :  { %2957 = vmatprep.subr.bf16.mxu1 %v3070_v3 }
 0x147   :  { %2902 = vmatpush3.bf16.msra.mxu0 %v3432_v57 }
 0x148   :  { %2903 = vmatprep.subr.bf16.mxu0 %v3070_v3 }
 0x149   :  { %2959 = vmatpush3.bf16.msra.mxu1 %v3450_v14 }
 0x14a   :  { %2611 = vmatmul.mubr.f32.vlgmr.msra.gmra.mrb[4].mxu0 %v1159_v36  ;;  %2960 = vmatprep.subr.bf16.mxu1 %v3070_v3 }
 0x14b   :  { %2905 = vmatpush3.bf16.msra.mxu0 %v3454_v19  ;;  %2629 = vmatprep.mubr.msk.f32.mxu0 %vm3071_vm0, %v3072_v8 }
 0x14c   :  { %2906 = vmatprep.subr.bf16.mxu0 %v3070_v3 }
 0x14d   :  { %2962 = vmatpush3.bf16.msra.mxu1 %v3452_v18 }
 0x14e   :  { %2963 = vmatprep.subr.bf16.mxu1 %v3070_v3 }
 0x14f   :  { %2908 = vmatpush3.bf16.msra.mxu0 %v3456_v20 }
 0x150   :  { %2909 = vmatprep.subr.bf16.mxu0 %v3070_v3  ;;  %2706 = vmatmul.mubr.f32.vlgmr.msra.gmra.mrb[2].mxu1 %v3502_v61 }
 0x151   :  { %2965 = vmatpush3.bf16.msra.mxu1 %v3396_v25  ;;  %2724 = vmatprep.mubr.msk.f32.mxu1 %vm3071_vm0, %v3072_v8 }
 0x152   :  { %2966 = vmatprep.subr.bf16.mxu1 %v3070_v3 }
 0x153   :  { %2911 = vmatpush3.bf16.msra.mxu0 %v3458_v21 }
 0x154   :  { %2912 = vmatprep.subr.bf16.mxu0 %v3070_v3 }
 0x155   :  { %2968 = vmatpush3.bf16.msra.mxu1 %v3408_v30 }
 0x156   :  { %2969 = vmatprep.subr.bf16.mxu1 %v3070_v3 }
 0x157   :  { %2914 = vmatpush3.bf16.msra.mxu0 %v3460_v22 }
 0x158   :  { %2915 = vmatprep.subr.bf16.mxu0 %v3070_v3 }
 0x159   :  { %2971 = vmatpush3.bf16.msra.mxu1 %v3420_v39 }
 0x15a   :  { %2630 = vmatmul.mubr.f32.vlgmr.msra.gmra.mrb[4].mxu0 %v3471_v31  ;;  %2972 = vmatprep.subr.bf16.mxu1 %v3070_v3 }
 0x15b   :  { %2917 = vmatpush3.bf16.msra.mxu0 %v3396_v25  ;;  %2648 = vmatprep.mubr.msk.f32.mxu0 %vm3071_vm0, %v3072_v8 }
 0x15c   :  { %2918 = vmatprep.subr.bf16.mxu0 %v3070_v3 }
 0x15d   :  { %2974 = vmatpush3.bf16.msra.mxu1 %v3432_v57 }
 0x15e   :  { %2975 = vmatprep.subr.bf16.mxu1 %v3070_v3 }
 0x15f   :  { %2920 = vmatpush3.bf16.msra.mxu0 %v3408_v30 }
 0x160   :  { %2921 = vmatprep.subr.bf16.mxu0 %v3070_v3  ;;  %2725 = vmatmul.mubr.f32.vlgmr.msra.gmra.mrb[2].mxu1 %v1700_v62 }
 0x161   :  { %2977 = vmatpush3.bf16.msra.mxu1 %v3454_v19  ;;  %2743 = vmatprep.mubr.msk.f32.mxu1 %vm3071_vm0, %v3072_v8 }
 0x162   :  { %2978 = vmatprep.subr.bf16.mxu1 %v3070_v3 }
 0x163   :  { %2923 = vmatpush3.bf16.msra.mxu0 %v3420_v39 }
 0x164   :  { %2924 = vmatprep.subr.bf16.mxu0 %v3070_v3 }
 0x165   :  { %2980 = vmatpush3.bf16.msra.mxu1 %v3456_v20 }
 0x166   :  { %2981 = vmatprep.subr.bf16.mxu1 %v3070_v3 }
 0x167   :  { %2926 = vmatpush3.bf16.msra.mxu0 %v3432_v57 }
 0x169   :  { %2983 = vmatpush3.bf16.msra.mxu1 %v3458_v21 }
 0x16a   :  { %2649 = vmatmul.mubr.f32.vlgmr.msra.gmra.mrb[4].mxu0 %v3471_v31  ;;  %2984 = vmatprep.subr.bf16.mxu1 %v3070_v3 }
 0x16d   :  { %2986 = vmatpush3.bf16.msra.mxu1 %v3460_v22 }
 0x16e   :  { %2987 = vmatprep.subr.bf16.mxu1 %v3070_v3 }
 0x170   :  { %2744 = vmatmul.mubr.f32.vlgmr.msra.gmra.mrb[2].mxu1 %v3497_v60 }
 0x171   :  { %2989 = vmatpush3.bf16.msra.mxu1 %v3396_v25  ;;  %2762 = vmatprep.mubr.msk.f32.mxu1 %vm3071_vm0, %v3072_v8  ;;  %v2199_v25 = vld [vmem:[%s3643_s7] ss:$0 sm:$0xff] }
 0x172   :  { %2990 = vmatprep.subr.bf16.mxu1 %v3070_v3 }
 0x175   :  { %2992 = vmatpush3.bf16.msra.mxu1 %v3408_v30  ;;  %v2200_v30 = vld [vmem:[%s3643_s7 + $0x1] ss:$0 sm:$0xff]  ;;  %s3073_s7 = smov [#allocation3]  }
 0x176   :  { %2993 = vmatprep.subr.bf16.mxu1 %v3070_v3  ;;  %s2189_s4 = sshll.u32 %s3073_s7, 4  ;;  %s2190_s4 = int_to_ptr.vmem [resolvable:$true] %s2189_s4 }
 0x177   :  { %s3046_s29 = scalar_lea.vmem %s2190_s4, 128  ;;  %p3051_p1 = scmp.lt.s32.totalorder %s2190_s4, %s2190_s4 }
 0x178   :  { %p3047_p0 = scmp.ne.s32.totalorder %s2190_s4, %s3046_s29  ;;  %p3052_p2 = scmp.lt.s32.totalorder %s3046_s29, %s3046_s29 }
 0x179   :  { %2995 = vmatpush3.bf16.msra.mxu1 %v3420_v39 }
 0x17a   :  { %2996 = vmatprep.subr.bf16.mxu1 %v3070_v3  ;;  %p3053_p3 = por %p3052_p2, %p3051_p1 }
 0x17c   :  { %p3054_p4 = pnand %p3053_p3, %p3047_p0 }
 0x17d   :  { %2998 = vmatpush3.bf16.msra.mxu1 %v3432_v57 }
 0x180   :  { %2763 = vmatmul.mubr.f32.vlgmr.msra.gmra.mrb[2].mxu1 %v3497_v60 }
 0x23d   :  { %v1617_v1 = vpop.f32.mrb[4].mxu0 }
 0x23e   :  { %v3002_v8 = vadd.f32 %v2199_v25, %v1617_v1  ;;  %v2650_v2 = vpop.f32.mrb[5].mxu0 }
 0x240   :  { %v1621_v4 = vmax.f32 %v3002_v8, 0.0 }
 0x242   :  { %v2168_v5 = vmul.f32 %v2200_v30, %v1621_v4 }
 0x244   :  { %v2169_v39 = vsel %vm46_vm1, %v2168_v5, 0.0 }
 0x245   :  { %2170 = vadd.xlane.f32.xlu0 %v2169_v39 }
 0x253   :  { %v2158_v3 = vpop.f32.mrb[2].mxu1 }
 0x254   :  { %v3003_v57 = vadd.f32 %v2199_v25, %v2158_v3  ;;  %v2764_v6 = vpop.f32.mrb[3].mxu1 }
 0x256   :  { %v2162_v7 = vmax.f32 %v3003_v57, 0.0 }
 0x258   :  { %v2174_v9 = vmul.f32 %v2200_v30, %v2162_v7 }
 0x25a   :  { %v2175_v10 = vsel %vm46_vm1, %v2174_v9, 0.0 }
 0x25b   :  { %2176 = vadd.xlane.f32.xlu0 %v2175_v10 }
 0x2d2   :  { %v2171_v32 = vpop.xlane.xlu0 %2170 }
 0x2d3   :  { %v2173_v33 = vadd.f32 %v2172_v11, %v2171_v32 }
 0x2d5   :  { %v2179_v40 = vmul.f32 %v2173_v33, %v535_v28 }
 0x2e8   :  { %v2177_v35 = vpop.xlane.xlu0 %2176 }
 0x2e9   :  { %v2178_v38 = vadd.f32 %v2177_v35, %v2172_v11 }
 0x2eb   :  { %v2180_v41 = vmul.f32 %v2178_v38, %v1065_v58 }
 0x2ed   :  { %v2181_v43 = vadd.f32 %v2180_v41, %v2179_v40 }
 0x2ef   :  { %2182 = vst.msk [vmem:[#allocation3] sm:$0xff] %vm1080_vm3, %v2181_v43 }
 0x2f0   :  { %3057 = shalt.err (!%p3054_p4)
}
 0x2f1   :  { %s3058_s30 = scalar_lea.hbm %s3645_s9, 128 }
 0x2f2   :  { %p3059_p5 = scmp.ne.s32.totalorder %s3645_s9, %s3058_s30  ;;  %p3062_p6 = scmp.lt.u32.totalorder %s3058_s30, %s3645_s9 }
 0x2f4   :  { %p3064_p7 = pnand %p3062_p6, %p3059_p5 }
 0x2f6   :  { %3067 = shalt.err (!%p3064_p7)
}
 0x2f7   :  { %2192 = dma.vmem_to_hbm [thread:$0]  %s2190_s4, 128, %s3645_s9, [#allocation4]  }
 0x2f8   :  { %3068 = dma.done.wait [#allocation4], 128  }
 0x2f9   :  { %3069 = vsyncadd [#allocation4], 4294967168 }
 0x2fa   :  { %2196 = vsyncpa [#allocation4], 1 }

</bundles_post_ra>
